<compile_context>
chip_gen: v7x
topology: tpu7x:2x2x1
jax: 0.10.0
libtpu: 0.0.40
codegen_flags: <defaults>
</compile_context>

<pallas_src>
import functools

import jax
import jax.numpy as jnp
import numpy as np
from jax import lax
from jax.experimental import pallas as pl
from jax.experimental.pallas import tpu as pltpu

_LANE = 128
_SUBLANE = 8
_NEG_SLOPE = 0.01  # torch F.leaky_relu default


def _round_up(v, m):
    return (v + m - 1) // m * m


# ----------------------------- Pallas kernel -------------------------------
def _decoder_kernel(z_ref, w1_ref, b1_ref, w23_ref, b23_ref, out_ref, *, p_cols):
    """One batch tile of the fused GraphDecoder forward.

    z_ref   : (TB, L)        latent tile (streams per grid step)
    w1_ref  : (L, H)         linear1 weight, pre-transposed (resident)
    b1_ref  : (1, H)
    w23_ref : (H, OUT_PAD)   [W2 | W3 | 0-pad], lane-dense fused weight (resident)
    b23_ref : (1, OUT_PAD)   [b2 | b3 | 0]
    out_ref : (TB, OUT_PAD)  lane-dense fused output:
              cols [0, P)      -> sigmoid(linear2(x))              (adj_upper)
              cols [P, P+NF)   -> sigmoid(leaky_relu(linear3(x)))  (node feats)
              cols [P+NF, PAD) -> padding, sliced off in the wrapper
    """
    # x = leaky_relu(linear1(z))
    x = jnp.dot(z_ref[...], w1_ref[...], preferred_element_type=jnp.float32)
    x = x + b1_ref[...]
    x = jnp.where(x > 0, x, _NEG_SLOPE * x)

    # fused linear2 || linear3
    y = jnp.dot(x, w23_ref[...], preferred_element_type=jnp.float32)
    y = y + b23_ref[...]

    # leaky_relu only on the node-feature columns (col >= p_cols); adj_upper
    # columns keep the raw pre-activation.  One sigmoid covers both heads.
    col = lax.broadcasted_iota(jnp.int32, y.shape, 1)
    y = jnp.where((col >= p_cols) & (y < 0), _NEG_SLOPE * y, y)
    out_ref[...] = jax.nn.sigmoid(y)


# ----------------------------- wrappers --------------------------------------
@functools.partial(jax.jit, static_argnames=("max_num_nodes", "num_node_features"))
def graph_decoder_forward_batched(zs, params, *, max_num_nodes, num_node_features):
    """zs: (B, latent) -> adj (B, N, N), node_features (B, N, F)."""
    w1, b1, w2, b2, w3, b3 = params
    B, L = zs.shape
    H = w1.shape[1]
    P = w2.shape[1]
    NF = w3.shape[1]
    N = max_num_nodes
    F = num_node_features

    # ---- fuse linear2 / linear3 into one lane-dense (H, OUT_PAD) matmul ----
    out_pad = _round_up(P + NF, _LANE)
    w23 = jnp.zeros((H, out_pad), jnp.float32)
    w23 = w23.at[:, :P].set(w2).at[:, P:P + NF].set(w3)
    b23 = jnp.zeros((1, out_pad), jnp.float32)
    b23 = b23.at[:, :P].set(b2).at[:, P:P + NF].set(b3)
    b1r = b1.reshape(1, H)

    # ---- pad the batch to a multiple of the batch tile ----------------------
    tb = min(_round_up(max(B, 1), _SUBLANE), _LANE)
    b_pad = _round_up(B, tb)
    if b_pad != B:
        zs = jnp.pad(zs, ((0, b_pad - B), (0, 0)))

    kernel = functools.partial(_decoder_kernel, p_cols=P)

    fused = pl.pallas_call(
        kernel,
        out_shape=jax.ShapeDtypeStruct((b_pad, out_pad), jnp.float32),
        grid=(b_pad // tb,),
        in_specs=[
            pl.BlockSpec((tb, L), lambda b: (b, 0)),        # z tile (streams)
            pl.BlockSpec((L, H), lambda b: (0, 0)),         # W1 (resident)
            pl.BlockSpec((1, H), lambda b: (0, 0)),         # b1 (resident)
            pl.BlockSpec((H, out_pad), lambda b: (0, 0)),   # W2||W3 (resident)
            pl.BlockSpec((1, out_pad), lambda b: (0, 0)),   # b2||b3 (resident)
        ],
        out_specs=pl.BlockSpec((tb, out_pad), lambda b: (b, 0)),
        compiler_params=pltpu.CompilerParams(
            dimension_semantics=("parallel",)),             # v7x: both TCs
    )(zs, w1, b1r, w23, b23)

    fused = fused[:B]
    adj_upper = fused[:, :P]                        # sigmoid already applied
    node_features = fused[:, P:P + NF].reshape(B, N, F)

    # Symmetric strictly-upper-triangular scatter: O(N^2) data, done in XLA.
    # Row-major triu order matches torch's boolean-mask assignment exactly;
    # the diagonal is zero so torch's "- diag" is a no-op.
    iu, ju = np.triu_indices(N, k=1)
    adj = jnp.zeros((B, N, N), jnp.float32).at[:, iu, ju].set(adj_upper)
    adj = adj + jnp.swapaxes(adj, 1, 2)
    return adj, node_features


def graph_decoder_forward(z, params, *, max_num_nodes, num_node_features):
    """Single-z forward matching the torch module: returns ((N,N), (N,F))."""
    adj, nf = graph_decoder_forward_batched(
        z.reshape(1, -1), params,
        max_num_nodes=max_num_nodes, num_node_features=num_node_features)
    return adj[0], nf[0]


# ------------------------- param setup ----------------------------
def make_params(key, latent, hidden, output_dim, node_feat_out):
    """Deterministic torch.nn.Linear-style init, weights stored (in, out)."""
    def linear(key, fan_in, fan_out):
        k1, k2 = jax.random.split(key)
        bound = 1.0 / np.sqrt(fan_in)
        w = jax.random.uniform(k1, (fan_in, fan_out), jnp.float32, -bound, bound)
        b = jax.random.uniform(k2, (fan_out,), jnp.float32, -bound, bound)
        return w, b

    k1, k2, k3 = jax.random.split(key, 3)
    w1, b1 = linear(k1, latent, hidden)
    w2, b2 = linear(k2, hidden, output_dim)
    w3, b3 = linear(k3, hidden, node_feat_out)
    return (w1, b1, w2, b2, w3, b3)


# ---------------------------- reference (glue JAX) ---------------------------
def reference_forward_batched(zs, params, N, F):
    w1, b1, w2, b2, w3, b3 = params
    lrelu = lambda v: jnp.where(v > 0, v, 0.01 * v)
    x = lrelu(zs @ w1 + b1)
    au = jax.nn.sigmoid(x @ w2 + b2)
    nf = jax.nn.sigmoid(lrelu(x @ w3 + b3)).reshape(zs.shape[0], N, F)
    iu, ju = np.triu_indices(N, k=1)
    adj = jnp.zeros((zs.shape[0], N, N), jnp.float32).at[:, iu, ju].set(au)
    adj = adj + jnp.swapaxes(adj, 1, 2)
    return adj, nf


# ------------------------------- main ----------------------------------------
if __name__ == "__main__":
    # args (small, consistent with the module)
    latent_embeding_size = 32
    decoder_hidden_size = 64
    max_num_nodes = 8
    num_node_features = 4
    output_dim = max_num_nodes * (max_num_nodes - 1) // 2          # 28
    node_feat_out = num_node_features * max_num_nodes              # 32

    key = jax.random.PRNGKey(0)
    kp, kz, kb = jax.random.split(key, 3)
    params = make_params(kp, latent_embeding_size, decoder_hidden_size,
                         output_dim, node_feat_out)

    # ---- single-z forward (matches the torch module's forward signature) ----
    z = jax.random.normal(kz, (latent_embeding_size,), jnp.float32)
    adj, node_features = graph_decoder_forward(
        z, params, max_num_nodes=max_num_nodes,
        num_node_features=num_node_features)
    jax.block_until_ready((adj, node_features))

    adj_ref, nf_ref = reference_forward_batched(
        z.reshape(1, -1), params, max_num_nodes, num_node_features)
    np.testing.assert_allclose(np.asarray(adj), np.asarray(adj_ref[0]),
                               rtol=1e-5, atol=1e-5)
    np.testing.assert_allclose(np.asarray(node_features), np.asarray(nf_ref[0]),
                               rtol=1e-5, atol=1e-5)
    assert adj.shape == (max_num_nodes, max_num_nodes)
    assert node_features.shape == (max_num_nodes, num_node_features)

    # ---- batched forward: exercises the grid (2 batch tiles of 128) ---------
    B = 256
    zs = jax.random.normal(kb, (B, latent_embeding_size), jnp.float32)
    adj_b, nf_b = graph_decoder_forward_batched(
        zs, params, max_num_nodes=max_num_nodes,
        num_node_features=num_node_features)
    jax.block_until_ready((adj_b, nf_b))

    adj_bref, nf_bref = reference_forward_batched(
        zs, params, max_num_nodes, num_node_features)
    np.testing.assert_allclose(np.asarray(adj_b), np.asarray(adj_bref),
                               rtol=1e-5, atol=1e-5)
    np.testing.assert_allclose(np.asarray(nf_b), np.asarray(nf_bref),
                               rtol=1e-5, atol=1e-5)

    print("KERNEL_OK")
</pallas_src>

<mosaic_0001>
module attributes {stable_mosaic.version = 11 : i64} {
  func.func @_decoder_kernel(%arg0: i32, %arg1: memref<8x32xf32, #tpu.memory_space<vmem>>, %arg2: memref<32x64xf32, #tpu.memory_space<vmem>>, %arg3: memref<1x64xf32, #tpu.memory_space<vmem>>, %arg4: memref<64x128xf32, #tpu.memory_space<vmem>>, %arg5: memref<1x128xf32, #tpu.memory_space<vmem>>, %arg6: memref<8x128xf32, #tpu.memory_space<vmem>>) attributes {dimension_semantics = [#tpu.dimension_semantics<parallel>], iteration_bounds = array<i64: 1>, scalar_prefetch = 0 : i64, scratch_operands = 0 : i64, tpu.core_type = #tpu.core_type<tc>, window_params = [{transform_indices = @transform_0, window_bounds = array<i64: 8, 32>}, {pipeline_mode = #tpu.pipeline_mode<synchronous>, transform_indices = @transform_1, window_bounds = array<i64: 32, 64>}, {pipeline_mode = #tpu.pipeline_mode<synchronous>, transform_indices = @transform_2, window_bounds = array<i64: 1, 64>}, {pipeline_mode = #tpu.pipeline_mode<synchronous>, transform_indices = @transform_3, window_bounds = array<i64: 64, 128>}, {pipeline_mode = #tpu.pipeline_mode<synchronous>, transform_indices = @transform_4, window_bounds = array<i64: 1, 128>}, {transform_indices = @transform_5, window_bounds = array<i64: 8, 128>}]} {
    %c0 = arith.constant 0 : index
    %c0_0 = arith.constant 0 : index
    %0 = vector.load %arg1[%c0, %c0_0] : memref<8x32xf32, #tpu.memory_space<vmem>>, vector<8x32xf32>
    %c0_1 = arith.constant 0 : index
    %c0_2 = arith.constant 0 : index
    %1 = vector.load %arg2[%c0_1, %c0_2] : memref<32x64xf32, #tpu.memory_space<vmem>>, vector<32x64xf32>
    %cst = arith.constant dense<0.000000e+00> : vector<8x64xf32>
    %2 = tpu.matmul %0, %1, %cst {dimension_numbers = #tpu.dot_dimension_numbers<[1], [0], [0], [1], [0, 0, 1, 1], [], []>} : vector<8x32xf32>, vector<32x64xf32>, vector<8x64xf32> -> vector<8x64xf32>
    %c0_3 = arith.constant 0 : index
    %c0_4 = arith.constant 0 : index
    %3 = vector.load %arg3[%c0_3, %c0_4] : memref<1x64xf32, #tpu.memory_space<vmem>>, vector<1x64xf32>
    %4 = vector.broadcast %3 : vector<1x64xf32> to vector<8x64xf32>
    %5 = arith.addf %2, %4 : vector<8x64xf32>
    %cst_5 = arith.constant 0.000000e+00 : f32
    %6 = vector.broadcast %cst_5 : f32 to vector<8x64xf32>
    %7 = arith.cmpf ogt, %5, %6 : vector<8x64xf32>
    %cst_6 = arith.constant 0.00999999977 : f32
    %8 = vector.broadcast %cst_6 : f32 to vector<8x64xf32>
    %9 = arith.mulf %8, %5 : vector<8x64xf32>
    %10 = arith.select %7, %5, %9 : vector<8x64xi1>, vector<8x64xf32>
    %c0_7 = arith.constant 0 : index
    %c0_8 = arith.constant 0 : index
    %11 = vector.load %arg4[%c0_7, %c0_8] : memref<64x128xf32, #tpu.memory_space<vmem>>, vector<64x128xf32>
    %cst_9 = arith.constant dense<0.000000e+00> : vector<8x128xf32>
    %12 = tpu.matmul %10, %11, %cst_9 {dimension_numbers = #tpu.dot_dimension_numbers<[1], [0], [0], [1], [0, 0, 1, 1], [], []>} : vector<8x64xf32>, vector<64x128xf32>, vector<8x128xf32> -> vector<8x128xf32>
    %c0_10 = arith.constant 0 : index
    %c0_11 = arith.constant 0 : index
    %13 = vector.load %arg5[%c0_10, %c0_11] : memref<1x128xf32, #tpu.memory_space<vmem>>, vector<1x128xf32>
    %14 = vector.broadcast %13 : vector<1x128xf32> to vector<8x128xf32>
    %15 = arith.addf %12, %14 : vector<8x128xf32>
    %16 = tpu.iota {dimensions = array<i32: 1>} : vector<8x128xi32>
    %c28_i32 = arith.constant 28 : i32
    %17 = vector.broadcast %c28_i32 : i32 to vector<8x128xi32>
    %18 = arith.cmpi sge, %16, %17 : vector<8x128xi32>
    %cst_12 = arith.constant 0.000000e+00 : f32
    %19 = vector.broadcast %cst_12 : f32 to vector<8x128xf32>
    %20 = arith.cmpf olt, %15, %19 : vector<8x128xf32>
    %21 = arith.andi %18, %20 : vector<8x128xi1>
    %cst_13 = arith.constant 0.00999999977 : f32
    %22 = vector.broadcast %cst_13 : f32 to vector<8x128xf32>
    %23 = arith.mulf %22, %15 : vector<8x128xf32>
    %24 = arith.select %21, %23, %15 : vector<8x128xi1>, vector<8x128xf32>
    %25 = arith.negf %24 : vector<8x128xf32>
    %26 = math.exp %25 : vector<8x128xf32>
    %cst_14 = arith.constant 1.000000e+00 : f32
    %27 = vector.broadcast %cst_14 : f32 to vector<8x128xf32>
    %28 = arith.addf %27, %26 : vector<8x128xf32>
    %29 = arith.divf %27, %28 : vector<8x128xf32>
    %c0_15 = arith.constant 0 : index
    %c0_16 = arith.constant 0 : index
    %30 = vector.load %arg6[%c0_15, %c0_16] : memref<8x128xf32, #tpu.memory_space<vmem>>, vector<8x128xf32>
    tpu.vector_store %arg6[%c0_15, %c0_16], %29 {strides = array<i32>} : memref<8x128xf32, #tpu.memory_space<vmem>>, vector<8x128xf32>,
    return
  }
  func.func @transform_0(%arg0: i32) -> (i32, i32) {
    %c0_i32 = arith.constant 0 : i32
    %c0_i32_0 = arith.constant 0 : i32
    return %arg0, %c0_i32 : i32, i32
  }
  func.func @transform_1(%arg0: i32) -> (i32, i32) {
    %c0_i32 = arith.constant 0 : i32
    %c0_i32_0 = arith.constant 0 : i32
    %c0_i32_1 = arith.constant 0 : i32
    return %c0_i32, %c0_i32_0 : i32, i32
  }
  func.func @transform_2(%arg0: i32) -> (i32, i32) {
    %c0_i32 = arith.constant 0 : i32
    %c0_i32_0 = arith.constant 0 : i32
    %c0_i32_1 = arith.constant 0 : i32
    return %c0_i32, %c0_i32_0 : i32, i32
  }
  func.func @transform_3(%arg0: i32) -> (i32, i32) {
    %c0_i32 = arith.constant 0 : i32
    %c0_i32_0 = arith.constant 0 : i32
    %c0_i32_1 = arith.constant 0 : i32
    return %c0_i32, %c0_i32_0 : i32, i32
  }
  func.func @transform_4(%arg0: i32) -> (i32, i32) {
    %c0_i32 = arith.constant 0 : i32
    %c0_i32_0 = arith.constant 0 : i32
    %c0_i32_1 = arith.constant 0 : i32
    return %c0_i32, %c0_i32_0 : i32, i32
  }
  func.func @transform_5(%arg0: i32) -> (i32, i32) {
    %c0_i32 = arith.constant 0 : i32
    %c0_i32_0 = arith.constant 0 : i32
    return %arg0, %c0_i32 : i32, i32
  }
}

</mosaic_0001>

<bundles_post_ra>
// kernel: graph_decoder_forward_batched.1
= control target key start
LH: loop header
LB: loop body
LE: loop exit
PB: predicated region body
PF: predicated region fallthrough
CT: control target
= control target key end

     0   :  { %v290_v0 = vmov 0.0|0.0   ;;  %vm291_vm0 = vmmov 0   ;;  %v292_v4 = vmov 0.0   ;;  %vm32_vm1 = vcmask 261120   ;;  %s371_s1 = inlined_call_operand.vmem [shape: f32[32,64], index: 1, kind: input, shape index: {}]   ;;  %s372_s3 = inlined_call_operand.vmem [shape: f32[64,128], index: 3, kind: input, shape index: {}]   ;;  %s373_s0 = inlined_call_operand.vmem [shape: f32[8,32], index: 0, kind: input, shape index: {}]   ;;  %s374_s2 = inlined_call_operand.vmem [shape: f32[1,64], index: 2, kind: input, shape index: {}]   ;;  %s375_s4 = inlined_call_operand.vmem [shape: f32[1,128], index: 4, kind: input, shape index: {}]   ;;  %s376_s5 = inlined_call_operand.vmem [shape: f32[8,128], index: 5, kind: output, shape index: {}]  }
   0x1   :  { %265 = vmatprep.subr.bf16.mxu0 %v290_v0  ;;  %v21_v1 = vld [vmem:[%s371_s1] sm:$0xff]  ;;  %v22_v2 = vld [vmem:[%s371_s1 + $0x8] sm:$0xff]  ;;  %v23_v3 = vld [vmem:[%s371_s1 + $0x10] sm:$0xff]  ;;  %243 = vmatprep.mubr.msk.f32.mxu0 %vm291_vm0, %v292_v4  ;;  %vm124_vm3 = vcmask 523264   ;;  %v198_v27 = vlaneseq }
   0x2   :  { %v266_v5 = vpack.c.bf16 %v22_v2, %v21_v1  ;;  %v24_v6 = vld [vmem:[%s371_s1 + $0x18] sm:$0xff]  ;;  %271 = vmatprep.subr.bf16.mxu1 %v290_v0  ;;  %v109_v7 = vld [vmem:[%s372_s3] sm:$0xff]  ;;  %262 = vmatprep.mubr.msk.f32.mxu1 %vm291_vm0, %v292_v4  ;;  %v110_v8 = vld [vmem:[%s372_s3 + $0x8] sm:$0xff] }
   0x3   :  { %v111_v9 = vld [vmem:[%s372_s3 + $0x10] sm:$0xff]  ;;  %v112_v10 = vld [vmem:[%s372_s3 + $0x18] sm:$0xff]  ;;  %v269_v11 = vpack.c.bf16 %v24_v6, %v23_v3  ;;  %v272_v12 = vpack.c.bf16 %v110_v8, %v109_v7  ;;  %v113_v14 = vld [vmem:[%s372_s3 + $0x20] sm:$0xff]  ;;  %v199_v28 = vand.u32 127, %v198_v27 }
   0x4   :  { %267 = vmatpush3.bf16.msra.mxu0 %v266_v5  ;;  %v275_v13 = vpack.c.bf16 %v112_v10, %v111_v9  ;;  %v114_v15 = vld [vmem:[%s372_s3 + $0x28] sm:$0xff]  ;;  %v20_v16 = vld [vmem:[%s373_s0] sm:$0xff]  ;;  %v115_v18 = vld [vmem:[%s372_s3 + $0x30] sm:$0xff] }
   0x5   :  { %268 = vmatprep.subr.bf16.mxu0 %v290_v0  ;;  %273 = vmatpush3.bf16.msra.mxu1 %v272_v12  ;;  %v278_v17 = vpack.c.bf16 %v114_v15, %v113_v14  ;;  %v116_v19 = vld [vmem:[%s372_s3 + $0x38] sm:$0xff]  ;;  %v216_v21 = vld [vmem:[%s374_s2] ss:$0 sm:$0xff]  ;;  %vm200_vm4 = vcmp.ge.s32.totalorder %v199_v28, 28 }
   0x6   :  { %274 = vmatprep.subr.bf16.mxu1 %v290_v0  ;;  %v281_v20 = vpack.c.bf16 %v116_v19, %v115_v18  ;;  %v218_v29 = vld [vmem:[%s375_s4] ss:$0 sm:$0xff] }
   0x8   :  { %270 = vmatpush3.bf16.msra.mxu0 %v269_v11 }
   0x9   :  { %276 = vmatpush3.bf16.msra.mxu1 %v275_v13 }
   0xa   :  { %277 = vmatprep.subr.bf16.mxu1 %v290_v0 }
   0xb   :  { %244 = vmatmul.mubr.msk.f32.vlgmr.msra.gmra.mrb[0].mxu0 %vm32_vm1, %v20_v16 }
   0xd   :  { %279 = vmatpush3.bf16.msra.mxu1 %v278_v17 }
   0xe   :  { %280 = vmatprep.subr.bf16.mxu1 %v290_v0 }
  0x11   :  { %282 = vmatpush3.bf16.msra.mxu1 %v281_v20 }
  0xde   :  { %v102_v22 = vpop.f32.mrb[0].mxu0 }
  0xdf   :  { %v103_v23 = vadd.f32 %v216_v21, %v102_v22  ;;  %v245_v24 = vpop.f32.mrb[1].mxu0 }
  0xe1   :  { %vm106_vm2 = vcmp.gt.f32.partialorder %v103_v23, 0.0  ;;  %v107_v25 = vmul.f32 0.01, %v103_v23 }
  0xe3   :  { %v108_v26 = vsel %vm106_vm2, %v103_v23, %v107_v25 }
  0xe4   :  { %263 = vmatmul.mubr.msk.f32.vlgmr.msra.gmra.mrb[0].mxu1 %vm124_vm3, %v108_v26 }
 0x1b7   :  { %v194_v30 = vpop.f32.mrb[0].mxu1 }
 0x1b8   :  { %v195_v31 = vadd.f32 %v218_v29, %v194_v30  ;;  %v264_v32 = vpop.f32.mrb[1].mxu1 }
 0x1ba   :  { %vm201_vm5 = vcmp.lt.f32.partialorder %v195_v31, 0.0  ;;  %v203_v33 = vmul.f32 0.01, %v195_v31 }
 0x1bb   :  { %vm202_vm6 = vmand %vm200_vm4, %vm201_vm5 }
 0x1bc   :  { %v204_v34 = vsel %vm202_vm6, %v203_v33, %v195_v31 }
 0x1bd   :  { %v220_v35 = vmul.f32 -1.442695, %v204_v34 }
 0x1bf   :  { %286 = vpow2.f32 %v220_v35 }
 0x1c9   :  { %v287_v36 = vpop.eup %286 }
 0x1ca   :  { %v208_v37 = vadd.f32 1.0, %v287_v36 }
 0x1cc   :  { %288 = vrcp.f32 %v208_v37 }
 0x1d6   :  { %v289_v38 = vpop.eup %288 }
 0x1d7   :  { %211 = vst [vmem:[%s376_s5] sm:$0xff] %v289_v38 }

</bundles_post_ra>
